<compile_context>
chip_gen: v7x
topology: tpu7x:2x2x1
jax: 0.10.0
libtpu: 0.0.40
codegen_flags: <defaults>
</compile_context>

<pallas_src>
import jax
import jax.numpy as jnp
from jax.experimental import pallas as pl
from jax.experimental.pallas import tpu as pltpu

# ----- model config (module defaults + small test shapes) -------------------
VOCAB = 32          # src_vocab_size
PAD_IDX = 0         # src_pad_idx (unused: make_src_mask returns None)
EMBED = 16          # embed_size
HEADS = 1           # heads (head_dim == EMBED)  # TODO(synk): generalize H>1
FWD_EXP = 4
FF = FWD_EXP * EMBED
MAX_LEN = 512
N_BATCH = 2
SEQ = 8
LN_EPS = 1e-5       # nn.LayerNorm default
VEC_LANES = 128     # lane-aligned packed-vector slab width

# rows of the packed small-vector slab
_VEC_BO, _VEC_G1, _VEC_BE1, _VEC_G2, _VEC_BE2, _VEC_BF2, _VEC_BF1 = range(7)


def transformer_block_kernel(
    x_ref,        # (1, S, E)  one sequence per grid step
    wq_ref,       # (E, E)  pre-transposed, pre-scaled by 1/sqrt(E)
    wk_ref,       # (E, E)  pre-transposed
    wv_ref,       # (E, E)  pre-transposed
    wo_ref,       # (E, E)  pre-transposed fc_out
    w1_ref,       # (E, FF) pre-transposed FF layer 1
    w2_ref,       # (FF, E) pre-transposed FF layer 2
    vec_ref,      # (8, 128) packed biases / LN params (lane/sublane aligned)
    o_ref,        # (1, S, E)  output
):
    f32 = jnp.float32
    E = EMBED

    x = x_ref[0]                             # (S, E)

    vec = vec_ref[...]                       # (8, 128), one clean vreg load
    bo  = vec[_VEC_BO:_VEC_BO + 1, :E]
    g1  = vec[_VEC_G1:_VEC_G1 + 1, :E]
    be1 = vec[_VEC_BE1:_VEC_BE1 + 1, :E]
    g2  = vec[_VEC_G2:_VEC_G2 + 1, :E]
    be2 = vec[_VEC_BE2:_VEC_BE2 + 1, :E]
    bf2 = vec[_VEC_BF2:_VEC_BF2 + 1, :E]
    bf1 = vec[_VEC_BF1:_VEC_BF1 + 1, :FF]

    def layer_norm(h, gamma, beta):
        mu = jnp.mean(h, axis=-1, keepdims=True)
        var = jnp.mean(jnp.square(h - mu), axis=-1, keepdims=True)
        return (h - mu) * jax.lax.rsqrt(var + LN_EPS) * gamma + beta

    # --- Q/K/V projections (three aligned matmuls; scale folded into wq) ---
    q = jnp.dot(x, wq_ref[...], preferred_element_type=f32)   # (S, E)
    k = jnp.dot(x, wk_ref[...], preferred_element_type=f32)   # (S, E)
    v = jnp.dot(x, wv_ref[...], preferred_element_type=f32)   # (S, E)

    # --- attention scores for this sequence only: (S, S), no mask needed ---
    energy = jax.lax.dot_general(
        q, k, (((1,), (1,)), ((), ())), preferred_element_type=f32)

    # softmax over the key axis (dim=3 of the nhqk tensor in the reference)
    energy = energy - jnp.max(energy, axis=-1, keepdims=True)
    p = jnp.exp(energy)
    attn = p / jnp.sum(p, axis=-1, keepdims=True)

    ctx = jnp.dot(attn, v, preferred_element_type=f32)              # (S, E)
    attn_out = jnp.dot(ctx, wo_ref[...], preferred_element_type=f32) + bo

    # --- residual + norm1 ---
    x1 = layer_norm(attn_out + x, g1, be1)

    # --- feed forward: Linear(E,4E) -> ReLU -> Linear(4E,E) ---
    hidden = jnp.maximum(
        jnp.dot(x1, w1_ref[...], preferred_element_type=f32) + bf1, 0.0)
    ff = jnp.dot(hidden, w2_ref[...], preferred_element_type=f32) + bf2

    # --- residual + norm2 ---
    o_ref[0] = layer_norm(ff + x1, g2, be2)


def make_params(key):
    ks = jax.random.split(key, 10)
    s = 0.1
    p = {
        "word_emb": jax.random.normal(ks[0], (VOCAB, EMBED), jnp.float32) * s,
        "pos_emb":  jax.random.normal(ks[1], (MAX_LEN, EMBED), jnp.float32) * s,
        "wq": jax.random.normal(ks[2], (EMBED, EMBED), jnp.float32) * s,
        "wk": jax.random.normal(ks[3], (EMBED, EMBED), jnp.float32) * s,
        "wv": jax.random.normal(ks[4], (EMBED, EMBED), jnp.float32) * s,
        "wo": jax.random.normal(ks[5], (EMBED, EMBED), jnp.float32) * s,
        "bo": jax.random.normal(ks[6], (1, EMBED), jnp.float32) * s,
        "g1": jnp.ones((1, EMBED), jnp.float32),
        "be1": jnp.zeros((1, EMBED), jnp.float32),
        "g2": jnp.ones((1, EMBED), jnp.float32),
        "be2": jnp.zeros((1, EMBED), jnp.float32),
        "w1": jax.random.normal(ks[7], (FF, EMBED), jnp.float32) * s,
        "bf1": jax.random.normal(ks[8], (1, FF), jnp.float32) * s,
        "w2": jax.random.normal(ks[9], (EMBED, FF), jnp.float32) * s,
        "bf2": jnp.zeros((1, EMBED), jnp.float32),
    }
    return p


def _pack_weights(params):
    """Pre-transpose Linear weights, fold the softmax scale into wq, and pack
    all small vectors into one lane/sublane-aligned (8, 128) slab."""
    inv_sqrt_e = 1.0 / (EMBED ** 0.5)
    w_q = params["wq"].T * inv_sqrt_e                               # (E, E)
    w_k = params["wk"].T                                            # (E, E)
    w_v = params["wv"].T                                            # (E, E)
    w_o = params["wo"].T                                            # (E, E)
    w_ff1 = params["w1"].T                                          # (E, FF)
    w_ff2 = params["w2"].T                                          # (FF, E)

    def pad_row(v):
        v = v.reshape(1, -1)
        return jnp.pad(v, ((0, 0), (0, VEC_LANES - v.shape[1])))

    rows = [pad_row(params[k]) for k in ("bo", "g1", "be1", "g2", "be2", "bf2")]
    rows.append(pad_row(params["bf1"]))
    rows.append(jnp.zeros((1, VEC_LANES), jnp.float32))             # pad row
    vec = jnp.concatenate(rows, axis=0)                             # (8, 128)
    return w_q, w_k, w_v, w_o, w_ff1, w_ff2, vec


def dual_transformer_forward(tokens, params):
    """tokens: (N, S) int32 token ids."""
    N, S = tokens.shape
    # --- encoder embedding (glue, gather stays in plain JAX) ---
    positions = jnp.arange(S)
    x = params["word_emb"][tokens] + params["pos_emb"][positions][None, :, :]
    x = x.astype(jnp.float32)                                       # (N, S, E)

    weights = _pack_weights(params)

    # Grid over the batch: one sequence per step, marked "parallel" so the two
    # TensorCores on v7x can split the batch (near-zero effect on v5e/v6e).
    out = pl.pallas_call(
        transformer_block_kernel,
        out_shape=jax.ShapeDtypeStruct((N, S, EMBED), jnp.float32),
        grid=(N,),
        in_specs=[pl.BlockSpec((1, S, EMBED), lambda n: (n, 0, 0))]
                 + [pl.BlockSpec(w.shape, lambda n: (0, 0)) for w in weights],
        out_specs=pl.BlockSpec((1, S, EMBED), lambda n: (n, 0, 0)),
        compiler_params=pltpu.CompilerParams(
            dimension_semantics=("parallel",)),
    )(x, *weights)
    return out


def reference_forward(tokens, params):
    """Pure-JAX reference mirroring the PyTorch forward (for validation)."""
    N, S = tokens.shape
    x = params["word_emb"][tokens] + params["pos_emb"][jnp.arange(S)][None]
    q = x @ params["wq"].T
    k = x @ params["wk"].T
    v = x @ params["wv"].T
    energy = jnp.einsum("nqd,nkd->nqk", q, k) / (EMBED ** 0.5)
    attn = jax.nn.softmax(energy, axis=-1)
    ctx = jnp.einsum("nqk,nkd->nqd", attn, v)
    attn_out = ctx @ params["wo"].T + params["bo"]

    def ln(h, g, b):
        mu = jnp.mean(h, axis=-1, keepdims=True)
        var = jnp.mean((h - mu) ** 2, axis=-1, keepdims=True)
        return (h - mu) / jnp.sqrt(var + LN_EPS) * g + b

    x1 = ln(attn_out + x, params["g1"], params["be1"])
    hid = jnp.maximum(x1 @ params["w1"].T + params["bf1"], 0.0)
    ff = hid @ params["w2"].T + params["bf2"]
    return ln(ff + x1, params["g2"], params["be2"])


if __name__ == "__main__":
    key = jax.random.PRNGKey(0)
    kp, kt = jax.random.split(key)
    params = make_params(kp)
    tokens = jax.random.randint(kt, (N_BATCH, SEQ), 0, VOCAB, dtype=jnp.int32)

    out = dual_transformer_forward(tokens, params)
    out = jax.block_until_ready(out)

    ref = reference_forward(tokens, params)
    assert out.shape == (N_BATCH, SEQ, EMBED)
    assert jnp.allclose(out, ref, atol=1e-4, rtol=1e-4), "mismatch vs reference"
    print("KERNEL_OK")
</pallas_src>

<mosaic_0001>
module attributes {stable_mosaic.version = 11 : i64} {
  func.func @transformer_block_kernel(%arg0: i32, %arg1: memref<1x8x16xf32, #tpu.memory_space<vmem>>, %arg2: memref<16x16xf32, #tpu.memory_space<vmem>>, %arg3: memref<16x16xf32, #tpu.memory_space<vmem>>, %arg4: memref<16x16xf32, #tpu.memory_space<vmem>>, %arg5: memref<16x16xf32, #tpu.memory_space<vmem>>, %arg6: memref<16x64xf32, #tpu.memory_space<vmem>>, %arg7: memref<64x16xf32, #tpu.memory_space<vmem>>, %arg8: memref<8x128xf32, #tpu.memory_space<vmem>>, %arg9: memref<1x8x16xf32, #tpu.memory_space<vmem>>) attributes {dimension_semantics = [#tpu.dimension_semantics<parallel>], iteration_bounds = array<i64: 2>, scalar_prefetch = 0 : i64, scratch_operands = 0 : i64, tpu.core_type = #tpu.core_type<tc>, window_params = [{transform_indices = @transform_0, window_bounds = array<i64: 1, 8, 16>}, {pipeline_mode = #tpu.pipeline_mode<synchronous>, transform_indices = @transform_1, window_bounds = array<i64: 16, 16>}, {pipeline_mode = #tpu.pipeline_mode<synchronous>, transform_indices = @transform_2, window_bounds = array<i64: 16, 16>}, {pipeline_mode = #tpu.pipeline_mode<synchronous>, transform_indices = @transform_3, window_bounds = array<i64: 16, 16>}, {pipeline_mode = #tpu.pipeline_mode<synchronous>, transform_indices = @transform_4, window_bounds = array<i64: 16, 16>}, {pipeline_mode = #tpu.pipeline_mode<synchronous>, transform_indices = @transform_5, window_bounds = array<i64: 16, 64>}, {pipeline_mode = #tpu.pipeline_mode<synchronous>, transform_indices = @transform_6, window_bounds = array<i64: 64, 16>}, {pipeline_mode = #tpu.pipeline_mode<synchronous>, transform_indices = @transform_7, window_bounds = array<i64: 8, 128>}, {transform_indices = @transform_8, window_bounds = array<i64: 1, 8, 16>}]} {
    %c0 = arith.constant 0 : index
    %c0_0 = arith.constant 0 : index
    %c0_1 = arith.constant 0 : index
    %0 = vector.load %arg1[%c0, %c0_0, %c0_1] : memref<1x8x16xf32, #tpu.memory_space<vmem>>, vector<1x8x16xf32>
    %1 = vector.shape_cast %0 : vector<1x8x16xf32> to vector<8x16xf32>
    %c0_2 = arith.constant 0 : index
    %c0_3 = arith.constant 0 : index
    %2 = vector.load %arg8[%c0_2, %c0_3] : memref<8x128xf32, #tpu.memory_space<vmem>>, vector<8x128xf32>
    %3 = vector.extract_strided_slice %2 {offsets = [0, 0], sizes = [1, 16], strides = [1, 1]} : vector<8x128xf32> to vector<1x16xf32>
    %4 = vector.extract_strided_slice %2 {offsets = [1, 0], sizes = [1, 16], strides = [1, 1]} : vector<8x128xf32> to vector<1x16xf32>
    %5 = vector.extract_strided_slice %2 {offsets = [2, 0], sizes = [1, 16], strides = [1, 1]} : vector<8x128xf32> to vector<1x16xf32>
    %6 = vector.extract_strided_slice %2 {offsets = [3, 0], sizes = [1, 16], strides = [1, 1]} : vector<8x128xf32> to vector<1x16xf32>
    %7 = vector.extract_strided_slice %2 {offsets = [4, 0], sizes = [1, 16], strides = [1, 1]} : vector<8x128xf32> to vector<1x16xf32>
    %8 = vector.extract_strided_slice %2 {offsets = [5, 0], sizes = [1, 16], strides = [1, 1]} : vector<8x128xf32> to vector<1x16xf32>
    %9 = vector.extract_strided_slice %2 {offsets = [6, 0], sizes = [1, 64], strides = [1, 1]} : vector<8x128xf32> to vector<1x64xf32>
    %c0_4 = arith.constant 0 : index
    %c0_5 = arith.constant 0 : index
    %10 = vector.load %arg2[%c0_4, %c0_5] : memref<16x16xf32, #tpu.memory_space<vmem>>, vector<16x16xf32>
    %cst = arith.constant dense<0.000000e+00> : vector<8x16xf32>
    %11 = tpu.matmul %1, %10, %cst {dimension_numbers = #tpu.dot_dimension_numbers<[1], [0], [0], [1], [0, 0, 1, 1], [], []>} : vector<8x16xf32>, vector<16x16xf32>, vector<8x16xf32> -> vector<8x16xf32>
    %c0_6 = arith.constant 0 : index
    %c0_7 = arith.constant 0 : index
    %12 = vector.load %arg3[%c0_6, %c0_7] : memref<16x16xf32, #tpu.memory_space<vmem>>, vector<16x16xf32>
    %cst_8 = arith.constant dense<0.000000e+00> : vector<8x16xf32>
    %13 = tpu.matmul %1, %12, %cst_8 {dimension_numbers = #tpu.dot_dimension_numbers<[1], [0], [0], [1], [0, 0, 1, 1], [], []>} : vector<8x16xf32>, vector<16x16xf32>, vector<8x16xf32> -> vector<8x16xf32>
    %c0_9 = arith.constant 0 : index
    %c0_10 = arith.constant 0 : index
    %14 = vector.load %arg4[%c0_9, %c0_10] : memref<16x16xf32, #tpu.memory_space<vmem>>, vector<16x16xf32>
    %cst_11 = arith.constant dense<0.000000e+00> : vector<8x16xf32>
    %15 = tpu.matmul %1, %14, %cst_11 {dimension_numbers = #tpu.dot_dimension_numbers<[1], [0], [0], [1], [0, 0, 1, 1], [], []>} : vector<8x16xf32>, vector<16x16xf32>, vector<8x16xf32> -> vector<8x16xf32>
    %cst_12 = arith.constant dense<0.000000e+00> : vector<8x8xf32>
    %16 = tpu.matmul %11, %13, %cst_12 {dimension_numbers = #tpu.dot_dimension_numbers<[1], [1], [0], [0], [0, 0, 1, 0], [], []>} : vector<8x16xf32>, vector<8x16xf32>, vector<8x8xf32> -> vector<8x8xf32>
    %cst_13 = arith.constant dense<0xFF800000> : vector<8xf32>
    %17 = vector.multi_reduction <maximumf>, %16, %cst_13 [1] : vector<8x8xf32> to vector<8xf32>
    %18 = vector.shape_cast %17 : vector<8xf32> to vector<8x1xf32>
    %19 = vector.broadcast %18 : vector<8x1xf32> to vector<8x8xf32>
    %20 = arith.subf %16, %19 : vector<8x8xf32>
    %21 = math.exp %20 : vector<8x8xf32>
    %cst_14 = arith.constant dense<0.000000e+00> : vector<8xf32>
    %22 = vector.multi_reduction <add>, %21, %cst_14 [1] : vector<8x8xf32> to vector<8xf32>
    %23 = vector.shape_cast %22 : vector<8xf32> to vector<8x1xf32>
    %24 = vector.broadcast %23 : vector<8x1xf32> to vector<8x8xf32>
    %25 = arith.divf %21, %24 : vector<8x8xf32>
    %cst_15 = arith.constant dense<0.000000e+00> : vector<8x16xf32>
    %26 = tpu.matmul %25, %15, %cst_15 {dimension_numbers = #tpu.dot_dimension_numbers<[1], [0], [0], [1], [0, 0, 1, 1], [], []>} : vector<8x8xf32>, vector<8x16xf32>, vector<8x16xf32> -> vector<8x16xf32>
    %c0_16 = arith.constant 0 : index
    %c0_17 = arith.constant 0 : index
    %27 = vector.load %arg5[%c0_16, %c0_17] : memref<16x16xf32, #tpu.memory_space<vmem>>, vector<16x16xf32>
    %cst_18 = arith.constant dense<0.000000e+00> : vector<8x16xf32>
    %28 = tpu.matmul %26, %27, %cst_18 {dimension_numbers = #tpu.dot_dimension_numbers<[1], [0], [0], [1], [0, 0, 1, 1], [], []>} : vector<8x16xf32>, vector<16x16xf32>, vector<8x16xf32> -> vector<8x16xf32>
    %29 = vector.broadcast %3 : vector<1x16xf32> to vector<8x16xf32>
    %30 = arith.addf %28, %29 : vector<8x16xf32>
    %31 = arith.addf %30, %1 : vector<8x16xf32>
    %cst_19 = arith.constant dense<0.000000e+00> : vector<8xf32>
    %32 = vector.multi_reduction <add>, %31, %cst_19 [1] : vector<8x16xf32> to vector<8xf32>
    %33 = vector.shape_cast %32 : vector<8xf32> to vector<8x1xf32>
    %cst_20 = arith.constant 1.600000e+01 : f32
    %34 = vector.broadcast %cst_20 : f32 to vector<8x1xf32>
    %35 = arith.divf %33, %34 : vector<8x1xf32>
    %36 = vector.broadcast %35 : vector<8x1xf32> to vector<8x16xf32>
    %37 = arith.subf %31, %36 : vector<8x16xf32>
    %38 = arith.mulf %37, %37 : vector<8x16xf32>
    %cst_21 = arith.constant dense<0.000000e+00> : vector<8xf32>
    %39 = vector.multi_reduction <add>, %38, %cst_21 [1] : vector<8x16xf32> to vector<8xf32>
    %40 = vector.shape_cast %39 : vector<8xf32> to vector<8x1xf32>
    %cst_22 = arith.constant 1.600000e+01 : f32
    %41 = vector.broadcast %cst_22 : f32 to vector<8x1xf32>
    %42 = arith.divf %40, %41 : vector<8x1xf32>
    %43 = vector.broadcast %35 : vector<8x1xf32> to vector<8x16xf32>
    %44 = arith.subf %31, %43 : vector<8x16xf32>
    %cst_23 = arith.constant 9.99999974E-6 : f32
    %45 = vector.broadcast %cst_23 : f32 to vector<8x1xf32>
    %46 = arith.addf %42, %45 : vector<8x1xf32>
    %47 = math.rsqrt %46 : vector<8x1xf32>
    %48 = vector.broadcast %47 : vector<8x1xf32> to vector<8x16xf32>
    %49 = arith.mulf %44, %48 : vector<8x16xf32>
    %50 = vector.broadcast %4 : vector<1x16xf32> to vector<8x16xf32>
    %51 = arith.mulf %49, %50 : vector<8x16xf32>
    %52 = vector.broadcast %5 : vector<1x16xf32> to vector<8x16xf32>
    %53 = arith.addf %51, %52 : vector<8x16xf32>
    %c0_24 = arith.constant 0 : index
    %c0_25 = arith.constant 0 : index
    %54 = vector.load %arg6[%c0_24, %c0_25] : memref<16x64xf32, #tpu.memory_space<vmem>>, vector<16x64xf32>
    %cst_26 = arith.constant dense<0.000000e+00> : vector<8x64xf32>
    %55 = tpu.matmul %53, %54, %cst_26 {dimension_numbers = #tpu.dot_dimension_numbers<[1], [0], [0], [1], [0, 0, 1, 1], [], []>} : vector<8x16xf32>, vector<16x64xf32>, vector<8x64xf32> -> vector<8x64xf32>
    %56 = vector.broadcast %9 : vector<1x64xf32> to vector<8x64xf32>
    %57 = arith.addf %55, %56 : vector<8x64xf32>
    %cst_27 = arith.constant 0.000000e+00 : f32
    %58 = vector.broadcast %cst_27 : f32 to vector<8x64xf32>
    %59 = arith.maximumf %57, %58 : vector<8x64xf32>
    %c0_28 = arith.constant 0 : index
    %c0_29 = arith.constant 0 : index
    %60 = vector.load %arg7[%c0_28, %c0_29] : memref<64x16xf32, #tpu.memory_space<vmem>>, vector<64x16xf32>
    %cst_30 = arith.constant dense<0.000000e+00> : vector<8x16xf32>
    %61 = tpu.matmul %59, %60, %cst_30 {dimension_numbers = #tpu.dot_dimension_numbers<[1], [0], [0], [1], [0, 0, 1, 1], [], []>} : vector<8x64xf32>, vector<64x16xf32>, vector<8x16xf32> -> vector<8x16xf32>
    %62 = vector.broadcast %8 : vector<1x16xf32> to vector<8x16xf32>
    %63 = arith.addf %61, %62 : vector<8x16xf32>
    %64 = arith.addf %63, %53 : vector<8x16xf32>
    %cst_31 = arith.constant dense<0.000000e+00> : vector<8xf32>
    %65 = vector.multi_reduction <add>, %64, %cst_31 [1] : vector<8x16xf32> to vector<8xf32>
    %66 = vector.shape_cast %65 : vector<8xf32> to vector<8x1xf32>
    %cst_32 = arith.constant 1.600000e+01 : f32
    %67 = vector.broadcast %cst_32 : f32 to vector<8x1xf32>
    %68 = arith.divf %66, %67 : vector<8x1xf32>
    %69 = vector.broadcast %68 : vector<8x1xf32> to vector<8x16xf32>
    %70 = arith.subf %64, %69 : vector<8x16xf32>
    %71 = arith.mulf %70, %70 : vector<8x16xf32>
    %cst_33 = arith.constant dense<0.000000e+00> : vector<8xf32>
    %72 = vector.multi_reduction <add>, %71, %cst_33 [1] : vector<8x16xf32> to vector<8xf32>
    %73 = vector.shape_cast %72 : vector<8xf32> to vector<8x1xf32>
    %cst_34 = arith.constant 1.600000e+01 : f32
    %74 = vector.broadcast %cst_34 : f32 to vector<8x1xf32>
    %75 = arith.divf %73, %74 : vector<8x1xf32>
    %76 = vector.broadcast %68 : vector<8x1xf32> to vector<8x16xf32>
    %77 = arith.subf %64, %76 : vector<8x16xf32>
    %cst_35 = arith.constant 9.99999974E-6 : f32
    %78 = vector.broadcast %cst_35 : f32 to vector<8x1xf32>
    %79 = arith.addf %75, %78 : vector<8x1xf32>
    %80 = math.rsqrt %79 : vector<8x1xf32>
    %81 = vector.broadcast %80 : vector<8x1xf32> to vector<8x16xf32>
    %82 = arith.mulf %77, %81 : vector<8x16xf32>
    %83 = vector.broadcast %6 : vector<1x16xf32> to vector<8x16xf32>
    %84 = arith.mulf %82, %83 : vector<8x16xf32>
    %85 = vector.broadcast %7 : vector<1x16xf32> to vector<8x16xf32>
    %86 = arith.addf %84, %85 : vector<8x16xf32>
    %c0_36 = arith.constant 0 : index
    %c0_37 = arith.constant 0 : index
    %c0_38 = arith.constant 0 : index
    %87 = vector.load %arg9[%c0_36, %c0_37, %c0_38] : memref<1x8x16xf32, #tpu.memory_space<vmem>>, vector<1x8x16xf32>
    %88 = vector.shape_cast %87 : vector<1x8x16xf32> to vector<8x16xf32>
    %89 = vector.shape_cast %86 : vector<8x16xf32> to vector<1x8x16xf32>
    tpu.vector_store %arg9[%c0_36, %c0_37, %c0_38], %89 {strides = array<i32>} : memref<1x8x16xf32, #tpu.memory_space<vmem>>, vector<1x8x16xf32>,
    return
  }
  func.func @transform_0(%arg0: i32) -> (i32, i32, i32) {
    %c0_i32 = arith.constant 0 : i32
    %c0_i32_0 = arith.constant 0 : i32
    %c0_i32_1 = arith.constant 0 : i32
    return %arg0, %c0_i32, %c0_i32_0 : i32, i32, i32
  }
  func.func @transform_1(%arg0: i32) -> (i32, i32) {
    %c0_i32 = arith.constant 0 : i32
    %c0_i32_0 = arith.constant 0 : i32
    %c0_i32_1 = arith.constant 0 : i32
    return %c0_i32, %c0_i32_0 : i32, i32
  }
  func.func @transform_2(%arg0: i32) -> (i32, i32) {
    %c0_i32 = arith.constant 0 : i32
    %c0_i32_0 = arith.constant 0 : i32
    %c0_i32_1 = arith.constant 0 : i32
    return %c0_i32, %c0_i32_0 : i32, i32
  }
  func.func @transform_3(%arg0: i32) -> (i32, i32) {
    %c0_i32 = arith.constant 0 : i32
    %c0_i32_0 = arith.constant 0 : i32
    %c0_i32_1 = arith.constant 0 : i32
    return %c0_i32, %c0_i32_0 : i32, i32
  }
  func.func @transform_4(%arg0: i32) -> (i32, i32) {
    %c0_i32 = arith.constant 0 : i32
    %c0_i32_0 = arith.constant 0 : i32
    %c0_i32_1 = arith.constant 0 : i32
    return %c0_i32, %c0_i32_0 : i32, i32
  }
  func.func @transform_5(%arg0: i32) -> (i32, i32) {
    %c0_i32 = arith.constant 0 : i32
    %c0_i32_0 = arith.constant 0 : i32
    %c0_i32_1 = arith.constant 0 : i32
    return %c0_i32, %c0_i32_0 : i32, i32
  }
  func.func @transform_6(%arg0: i32) -> (i32, i32) {
    %c0_i32 = arith.constant 0 : i32
    %c0_i32_0 = arith.constant 0 : i32
    %c0_i32_1 = arith.constant 0 : i32
    return %c0_i32, %c0_i32_0 : i32, i32
  }
  func.func @transform_7(%arg0: i32) -> (i32, i32) {
    %c0_i32 = arith.constant 0 : i32
    %c0_i32_0 = arith.constant 0 : i32
    %c0_i32_1 = arith.constant 0 : i32
    return %c0_i32, %c0_i32_0 : i32, i32
  }
  func.func @transform_8(%arg0: i32) -> (i32, i32, i32) {
    %c0_i32 = arith.constant 0 : i32
    %c0_i32_0 = arith.constant 0 : i32
    %c0_i32_1 = arith.constant 0 : i32
    return %arg0, %c0_i32, %c0_i32_0 : i32, i32, i32
  }
}

</mosaic_0001>

<bundles_post_ra>
// kernel: tpu_custom_call.1
= control target key start
LH: loop header
LB: loop body
LE: loop exit
PB: predicated region body
PF: predicated region fallthrough
CT: control target
= control target key end

     0   :  { %13 = vsyncpa [#allocation3], 0  ;;  %s1682_s0 = inlined_call_operand.vmem [shape: f32[2,8,16], index: 0, kind: input, shape index: {}]   ;;  %s1683_s1 = inlined_call_operand.vmem [shape: f32[16,16], index: 1, kind: input, shape index: {}]   ;;  %s1684_s2 = inlined_call_operand.vmem [shape: f32[16,16], index: 2, kind: input, shape index: {}]   ;;  %s1685_s3 = inlined_call_operand.vmem [shape: f32[16,16], index: 3, kind: input, shape index: {}]   ;;  %s1686_s4 = inlined_call_operand.vmem [shape: f32[16,16], index: 4, kind: input, shape index: {}]   ;;  %s1687_s5 = inlined_call_operand.hbm [shape: f32[16,64], index: 5, kind: input, shape index: {}]   ;;  %s1688_s6 = inlined_call_operand.vmem [shape: f32[64,16], index: 6, kind: input, shape index: {}]   ;;  %s1689_s7 = inlined_call_operand.vmem [shape: f32[8,128], index: 7, kind: input, shape index: {}]   ;;  %s1690_s8 = inlined_call_operand.hbm [shape: f32[2,8,16], index: 8, kind: output, shape index: {}]  }
   0x1   :  { %14 = vsyncpa [#allocation4], 0 }
   0x2   :  { %16 = vsyncpa [#allocation4 + $0x1], 0  ;;  %s1430_s27 = smov 0   ;;  %s1432_s28 = smov 0  }
   0x3   :  { %s1434_s29 = smov 0   ;;  %s1436_s30 = smov 0  }
   0x4 LB: > { %s1451_s9 = sadd.s32 4294967295, %s1376_s30   ;;  %s1079_s10 = sadd.s32 4294967294, %s1376_s30   ;;  %s1376_s30 = sphi %s1436_s30, %s1706_s30   ;;  %s1372_s29 = sphi %s1434_s29, %s1705_s29   ;;  %s1368_s28 = sphi %s1432_s28, %s1704_s28   ;;  %s1364_s27 = sphi %s1430_s27, %s1703_s27  }
   0x5   : > { %s1455_s11 = sadd.s32 1, %s1376_s30   ;;  %s202_s12 = sadd.s32 1, %s1372_s29 }
   0x6   : > { %s199_s13 = ssub.s32 %s1376_s30, %s1455_s11  ;;  %p212_p0 = scmp.ne.s32.totalorder %s1372_s29, %s1368_s28 }
   0x7   : > { %p200_p1 = scmp.eq.s32.totalorder %s199_s13, 0  ;;  %p213_p2 = scmp.eq.s32.totalorder %s1451_s9, 1 }
   0x8   : > { %p218_p3 = scmp.ne.s32.totalorder %s1368_s28, %s1364_s27  ;;  %p219_p4 = scmp.eq.s32.totalorder %s1079_s10, 1 }
   0x9   : > { %s1466_s14 = scalar_select %p200_p1, %s1372_s29, %s202_s12  }
   0xa   : > { %p1468_p5 = por %p213_p2, %p212_p0  ;;  %p1472_p6 = por %p219_p4, %p218_p3 }
   0xb   : > { %p1080_p7 = scmp.ge.s32.totalorder %s1376_s30, 1  ;;  %p226_p8 = scmp.lt.s32.totalorder %s1376_s30, 3 }
   0xc   : > { %s1694_s15 = scalar_select %p1468_p5, 1, 0 }
   0xd   : > { %s1695_s16 = scalar_select %p1472_p6, 1, 0 }
   0xe   : > { %p1691_p9 = scmp.eq.s32.totalorder %s1451_s9, 0  ;;  %p1479_p10 = pnand %p1080_p7, %p226_p8 }
   0xf   : > { %s1378_s18 = smov [#allocation2]   ;;  %s1282_s23 = scalar_lea.hbm %s1687_s5, 256 }
  0x10   : > { %s1696_s17 = scalar_select %p1479_p10, 1, 0 }
  0x11   : > { %s250_s19 = sshll.u32 %s1378_s18, 4  ;;  %p1225_p11 = pneg %p1479_p10  ;;  %s251_s19 = int_to_ptr.vmem [resolvable:$true] %s250_s19 }
  0x12   : > { %p1283_p13 = scmp.ne.s32.totalorder %s1687_s5, %s1282_s23  ;;  %p1289_p3 = scmp.lt.u32.totalorder %s1282_s23, %s1687_s5 }
  0x13   : > { %p1487_p12 = pnand %p1691_p9, %p1225_p11 }
  0x15   : > { %p1284_p0 = pneg %p1487_p12 }
  0x17   : > { %p1285_p1 = pnand %p1284_p0, %p1283_p13 }
  0x19   : > { %p1286_p2 = pneg %p1285_p1 }
  0x1b   : > { %p1291_p4 = pnand %p1289_p3, %p1286_p2 }
  0x1d   : > { %1294 = shalt.err (!%p1291_p4)
}
  0x1e   : > { %s1295_s12 = scalar_lea.vmem %s251_s19, 256  ;;  %p1303_p9 = scmp.lt.s32.totalorder %s251_s19, %s251_s19 }
  0x1f   : > { %p1296_p7 = scmp.ne.s32.totalorder %s251_s19, %s1295_s12  ;;  %p1304_p6 = scmp.lt.s32.totalorder %s1295_s12, %s1295_s12 }
  0x21   : > { %p1298_p8 = pnand %p1296_p7, %p1284_p0  ;;  %p1305_p5 = por %p1304_p6, %p1303_p9 }
  0x23   : > { %p1299_p11 = pneg %p1298_p8 }
  0x25   : > { %p1306_p10 = pnand %p1305_p5, %p1299_p11 }
  0x27   : > { %1309 = shalt.err (!%p1306_p10)
}
  0x28   : > { %s1379_s13 = smov 128   ;;  %s1380_s18 = smov 8  }
  0x29   : > { %1228 = dma.hbm_to_vmem [thread:$0]  (!%p1487_p12), %s1687_s5, 256, %s251_s19, [#allocation3], %s1379_s13, %s1379_s13, %s1380_s18  }
  0x2a   : > { %p1698_p13 = scmp.ne.s32.totalorder %s1696_s17, 0 }
  0x2b   : > { %p1699_p1 = scmp.eq.s32.totalorder (!%p1698_p13), %s1451_s9, 0 }
  0x2c   : > { %279 = sbr.rel (%p1698_p13) target bundleno = 2304 (0x900), region = 52 }
  0x33   : > { %1355 = dma.done.wait (%p1699_p1), [#allocation3], 256   ;;  %p1700_p0 = pmov %p1699_p1 }
  0x34   : > { %p312_p5 = scmp.lt.s32.totalorder %s1451_s9, 1  ;;  %v1381_v0 = vmov 0.0|0.0   ;;  %vm1382_vm0 = vmmov 0   ;;  %v1383_v1 = vmov 0.0   ;;  %v318_v2 = vld [vmem:[%s1683_s1] sm:$0xff]  ;;  %v319_v3 = vld [vmem:[%s1683_s1 + $0x8] sm:$0xff]  ;;  %v701_v34 = vlaneseq }
  0x35   : > { %1357 = vsyncadd (%p1700_p0), [#allocation3], 4294967040  ;;  %1192 = vmatprep.subr.bf16.mxu0 %v1381_v0  ;;  %1132 = vmatprep.mubr.msk.f32.mxu0 %vm1382_vm0, %v1383_v1  ;;  %v1193_v4 = vpack.c.bf16 %v319_v3, %v318_v2  ;;  %v394_v5 = vld [vmem:[%s1684_s2] sm:$0xff]  ;;  %v395_v6 = vld [vmem:[%s1684_s2 + $0x8] sm:$0xff]  ;;  %vm320_vm1 = vcmask 130048   ;;  %vm614_vm2 = vcmask 64512  }
  0x36   : > { %s313_s19 = scalar_select %p312_p5, %s1451_s9, 1  ;;  %1149 = vmatprep.subr.mxu1 %v1383_v1  ;;  %1151 = vmatprep.mubr.msk.f32.mxu1 %vm1382_vm0, %v1383_v1  ;;  %v1196_v8 = vpack.c.bf16 %v395_v6, %v394_v5  ;;  %v466_v13 = vld [vmem:[%s1685_s3] sm:$0xff]  ;;  %v467_v14 = vld [vmem:[%s1685_s3 + $0x8] sm:$0xff]  ;;  %v1580_v35 = vshrl.u32 %v701_v34, 7  ;;  %v885_v54 = vld [vmem:[%s1688_s6 + $0x10] sm:$0xff]  ;;  %vm895_vm3 = vcmask 523264  }
  0x37   : > { %1194 = vmatpush3.bf16.msra.mxu0 %v1193_v4  ;;  %v1199_v15 = vpack.c.bf16 %v467_v14, %v466_v13  ;;  %v699_v26 = vld [vmem:[%s1686_s4] sm:$0xff]  ;;  %v700_v27 = vld [vmem:[%s1686_s4 + $0x8] sm:$0xff]  ;;  %v886_v56 = vld [vmem:[%s1688_s6 + $0x18] sm:$0xff]  ;;  %s1097_s20 = sshll.u32 %s1451_s9, 7  ;;  %p1701_p9 = scmp.ne.s32.totalorder %s1694_s15, 0 }
  0x38   : > { %s1086_s17 = sshll.u32 %s313_s19, 3  ;;  %1195 = vmatprep.subr.bf16.mxu0 %v1381_v0  ;;  %v1202_v28 = vpack.c.bf16 %v700_v27, %v699_v26  ;;  %v703_v36 = vsub.s32 0, %v1580_v35  ;;  %v1586_v37 = vld [vmem:[%s1689_s7] sm:$0xff]  ;;  %v804_v50 = vld [vmem:[#allocation2 + $0x8] sm:$0xff]  ;;  %v1211_v57 = vpack.c.bf16 %v886_v56, %v885_v54  ;;  %v800_v2 = vsub.s32 2, %v1580_v35  ;;  %s309_s19 = sand.u32 1, %s1368_s28  }
  0x39   : > { %s315_s12 = scalar_lea.vmem %s1682_s0, %s1086_s17  ;;  %v803_v49 = vld [vmem:[#allocation2] sm:$0xff]  ;;  %v884_v53 = vld [vmem:[%s1688_s6 + $0x8] sm:$0xff]  ;;  %s1085_s17 = sshll.u32 %s309_s19, 3 }
  0x3a   : > { %v1536_v7 = vld [vmem:[%s315_s12] sm:$0xff]  ;;  %v704_v38 = vrot.slane %v1586_v37, %v703_v36  ;;  %v1205_v51 = vpack.c.bf16 %v804_v50, %v803_v49  ;;  %v888_v59 = vld [vmem:[%s1688_s6 + $0x28] sm:$0xff]  ;;  %v801_v6 = vrot.slane %v1586_v37, %v800_v2  ;;  %s311_s23 = scalar_lea.vmem [#allocation5], %s1085_s17  ;;  %s1639_s10 = scalar_lea.hbm %s1690_s8, %s1097_s20 }
  0x3b   : > { %1133 = vmatmul.mubr.msk.f32.vlgmr.msra.gmra.mrb[0].mxu0 %vm320_vm1, %v1536_v7  ;;  %v883_v52 = vld [vmem:[%s1688_s6] sm:$0xff]  ;;  %s1008_s24 = sshll.u32 %s311_s23, 4  ;;  %s995_s12 = scalar_lea.sflag [#allocation4], %s309_s19  ;;  %s1641_s24 = int_to_ptr.vmem [resolvable:$true] %s1008_s24 }
  0x3c   : > { %1197 = vmatpush3.bf16.msra.mxu0 %v1196_v8  ;;  %1139 = vmatprep.mubr.msk.f32.mxu0 %vm1382_vm0, %v1383_v1  ;;  %v1208_v55 = vpack.c.bf16 %v884_v53, %v883_v52  ;;  %v887_v58 = vld [vmem:[%s1688_s6 + $0x20] sm:$0xff]  ;;  %s1310_s13 = scalar_lea.vmem %s1641_s24, 128  ;;  %s1384_s9 = smov [#allocation5]  }
  0x3d   : > { %1198 = vmatprep.subr.bf16.mxu0 %v1381_v0  ;;  %v1214_v60 = vpack.c.bf16 %v888_v59, %v887_v58  ;;  %p1311_p6 = scmp.ne.s32.totalorder %s1641_s24, %s1310_s13  ;;  %s1314_s18 = sshll.u32 %s1384_s9, 4  ;;  %s1315_s18 = int_to_ptr.vmem [resolvable:$false] %s1314_s18 }
  0x3e   : > { %s1316_s21 = scalar_lea.vmem %s1315_s18, 256  ;;  %p1317_p2 = scmp.lt.s32.totalorder %s1641_s24, %s1315_s18 }
  0x3f   : > { %1140 = vmatmul.mubr.msk.f32.vlgmr.msra.gmra.mrb[2].mxu0 %vm320_vm1, %v1536_v7  ;;  %p1312_p10 = pnand %p1311_p6, %p1701_p9  ;;  %p1318_p3 = scmp.lt.s32.totalorder %s1316_s21, %s1310_s13 }
  0x40   : > { %1146 = vmatprep.mubr.msk.f32.mxu0 %vm1382_vm0, %v1383_v1  ;;  %1200 = vmatpush3.bf16.msra.mxu0 %v1199_v15 }
  0x41   : > { %1154 = vmatprep.subr.mxu0 %v1383_v1  ;;  %p1313_p12 = pneg %p1312_p10  ;;  %p1319_p4 = por %p1318_p3, %p1317_p2 }
  0x43   : > { %1147 = vmatmul.mubr.msk.f32.vlgmr.msra.gmra.mrb[4].mxu0 %vm320_vm1, %v1536_v7  ;;  %p1320_p7 = pnand %p1319_p4, %p1313_p12 }
  0x44   : > { %1156 = vmatprep.mubr.msk.f32.mxu0 %vm1382_vm0, %v1383_v1 }
 0x10e   : > { %v390_v9 = vpop.f32.mrb[0].mxu0 }
 0x10f   : > { %v1134_v10 = vpop.f32.mrb[1].mxu0 }
 0x112   : > { %v462_v11 = vpop.f32.mrb[2].mxu0 }
 0x113   : > { %v1141_v12 = vpop.f32.mrb[3].mxu0  ;;  %1150 = vmatpush3.xpose.msk.msra.mxu1 %vm320_vm1, %v462_v11  ;;  %v807_v11 = vsub.s32 6, %v1580_v35 }
 0x114   : > { %1201 = vmatprep.subr.bf16.mxu1 %v1381_v0 }
 0x115   : > { %v808_v12 = vrot.slane %v1586_v37, %v807_v11 }
 0x116   : > { %1152 = vmatmul.mubr.msk.f32.vlgmr.msra.gmra.mrb[0].mxu1 %vm320_vm1, %v390_v9  ;;  %v534_v24 = vpop.f32.mrb[4].mxu0  ;;  %v890_v9 = vld [vmem:[%s1688_s6 + $0x38] sm:$0xff] }
 0x117   : > { %1163 = vmatprep.mubr.msk.f32.mxu1 %vm1382_vm0, %v1383_v1  ;;  %v1148_v25 = vpop.f32.mrb[5].mxu0  ;;  %1155 = vmatpush3.msra.mxu0 %v534_v24 }
 0x118   : > { %1204 = vmatprep.subr.bf16.mxu0 %v1381_v0  ;;  %1203 = vmatpush3.bf16.msra.mxu1 %v1202_v28 }
 0x119   : > { %1207 = vmatprep.subr.bf16.mxu1 %v1381_v0 }
 0x1e9   : > { %v610_v16 = vpop.f32.mrb[0].mxu1 }
 0x1ea   : > { %v1153_v17 = vpop.f32.mrb[1].mxu1  ;;  %v615_v18 = vsel %vm614_vm2, %v610_v16, -inf }
 0x1eb   : > { %616 = vmax.xlane.f32.xlu0 %v615_v18  ;;  %v893_v17 = vsub.s32 5, %v1580_v35 }
 0x1ed   : > { %v894_v18 = vrot.slane %v1586_v37, %v893_v17 }
 0x278   : > { %v617_v19 = vpop.xlane.xlu0 %616 }
 0x279   : > { %v618_v20 = vsub.f32 %v610_v16, %v617_v19 }
 0x27b   : > { %v619_v21 = vmul.f32 1.442695, %v618_v20 }
 0x27d   : > { %1274 = vpow2.f32 %v619_v21 }
 0x287   : > { %v1275_v22 = vpop.eup %1274 }
 0x288   : > { %v621_v23 = vsel %vm614_vm2, %v1275_v22, 0.0 }
 0x289   : > { %622 = vadd.xlane.f32.xlu0 %v621_v23 }
 0x316   : > { %v623_v29 = vpop.xlane.xlu0 %622 }
 0x317   : > { %1276 = vrcp.f32 %v623_v29 }
 0x321   : > { %v1277_v30 = vpop.eup %1276 }
 0x322   : > { %v625_v31 = vmul.f32 %v1277_v30, %v1275_v22 }
 0x324   : > { %1157 = vmatmul.mubr.msk.f32.vlgmr.msra.gmra.mrb[6].mxu0 %vm614_vm2, %v625_v31 }
 0x325   : > { %1170 = vmatprep.mubr.msk.f32.mxu0 %vm1382_vm0, %v1383_v1  ;;  %1206 = vmatpush3.bf16.msra.mxu0 %v1205_v51 }
 0x3f7   : > { %v695_v32 = vpop.f32.mrb[6].mxu0 }
 0x3f8   : > { %v1158_v33 = vpop.f32.mrb[7].mxu0  ;;  %1164 = vmatmul.mubr.msk.f32.vlgmr.msra.gmra.mrb[2].mxu1 %vm320_vm1, %v695_v32  ;;  %v985_v32 = vsub.s32 3, %v1580_v35 }
 0x3f9   : > { %1189 = vmatprep.mubr.msk.f32.mxu1 %vm1382_vm0, %v1383_v1  ;;  %1209 = vmatpush3.bf16.msra.mxu1 %v1208_v55  ;;  %v795_v1 = vsub.s32 1, %v1580_v35  ;;  %v990_v33 = vsub.s32 4, %v1580_v35 }
 0x3fa   : > { %1210 = vmatprep.subr.bf16.mxu1 %v1381_v0  ;;  %v986_v34 = vrot.slane %v1586_v37, %v985_v32 }
 0x3fb   : > { %v796_v3 = vrot.slane %v1586_v37, %v795_v1 }
 0x3fd   : > { %1212 = vmatpush3.bf16.msra.mxu1 %v1211_v57 }
 0x3fe   : > { %1213 = vmatprep.subr.bf16.mxu1 %v1381_v0 }
 0x401   : > { %1215 = vmatpush3.bf16.msra.mxu1 %v1214_v60 }
 0x402   : > { %1216 = vmatprep.subr.bf16.mxu1 %v1381_v0  ;;  %v889_v0 = vld [vmem:[%s1688_s6 + $0x30] sm:$0xff] }
 0x403   : > { %v1217_v10 = vpack.c.bf16 %v890_v9, %v889_v0 }
 0x405   : > { %1218 = vmatpush3.bf16.msra.mxu1 %v1217_v10 }
 0x4cb   : > { %v774_v39 = vpop.f32.mrb[2].mxu1 }
 0x4cc   : > { %v775_v40 = vadd.f32 %v774_v39, %v704_v38  ;;  %v1165_v41 = vpop.f32.mrb[3].mxu1  ;;  %v991_v39 = vrot.slane %v1586_v37, %v990_v33 }
 0x4ce   : > { %v778_v42 = vadd.f32 %v775_v40, %v1536_v7 }
 0x4d0   : > { %v779_v43 = vsel %vm320_vm1, %v778_v42, 0.0 }
 0x4d1   : > { %780 = vadd.xlane.f32.xlu1 %v779_v43 }
 0x55e   : > { %v781_v44 = vpop.xlane.xlu1 %780 }
 0x55f   : > { %v783_v45 = vmul.f32 0.0625, %v781_v44 }
 0x561   : > { %v784_v46 = vsub.f32 %v778_v42, %v783_v45 }
 0x563   : > { %v785_v47 = vmul.f32 %v784_v46, %v784_v46 }
 0x565   : > { %v786_v48 = vsel %vm320_vm1, %v785_v47, 0.0 }
 0x566   : > { %787 = vadd.xlane.f32.xlu1 %v786_v48 }
 0x5f3   : > { %v788_v61 = vpop.xlane.xlu1 %787 }
 0x5f4   : > { %v789_v62 = vmul.f32 0.0625, %v788_v61 }
 0x5f6   : > { %v790_v63 = vadd.f32 1e-05, %v789_v62 }
 0x5f8   : > { %1278 = vrsqrt.f32 %v790_v63 }
 0x602   : > { %v1279_v4 = vpop.eup %1278 }
 0x603   : > { %v792_v5 = vmul.f32 %v1279_v4, %v784_v46 }
 0x605   : > { %v797_v7 = vmul.f32 %v796_v3, %v792_v5 }
 0x607   : > { %v802_v8 = vadd.f32 %v801_v6, %v797_v7 }
 0x609   : > { %1171 = vmatmul.mubr.msk.f32.vlgmr.msra.gmra.mrb[8].mxu0 %vm320_vm1, %v802_v8 }
 0x6dc   : > { %v878_v13 = vpop.f32.mrb[8].mxu0 }
 0x6dd   : > { %v879_v14 = vadd.f32 %v878_v13, %v808_v12  ;;  %v1172_v15 = vpop.f32.mrb[9].mxu0 }
 0x6df   : > { %v882_v16 = vmax.f32 %v879_v14, 0.0 }
 0x6e1   : > { %1190 = vmatmul.mubr.msk.f32.vlgmr.msra.gmra.mrb[4].mxu1 %vm895_vm3, %v882_v16 }
 0x7b4   : > { %v965_v19 = vpop.f32.mrb[4].mxu1 }
 0x7b5   : > { %v966_v20 = vadd.f32 %v965_v19, %v894_v18  ;;  %v1191_v21 = vpop.f32.mrb[5].mxu1 }
 0x7b7   : > { %v969_v22 = vadd.f32 %v966_v20, %v802_v8 }
 0x7b9   : > { %v970_v23 = vsel %vm320_vm1, %v969_v22, 0.0 }
 0x7ba   : > { %971 = vadd.xlane.f32.xlu0 %v970_v23 }
 0x847   : > { %v972_v24 = vpop.xlane.xlu0 %971 }
 0x848   : > { %v973_v25 = vmul.f32 0.0625, %v972_v24 }
 0x84a   : > { %v974_v26 = vsub.f32 %v969_v22, %v973_v25 }
 0x84c   : > { %v975_v27 = vmul.f32 %v974_v26, %v974_v26 }
 0x84e   : > { %v976_v28 = vsel %vm320_vm1, %v975_v27, 0.0 }
 0x84f   : > { %977 = vadd.xlane.f32.xlu1 %v976_v28 }
 0x8dc   : > { %v978_v29 = vpop.xlane.xlu1 %977 }
 0x8dd   : > { %v979_v30 = vmul.f32 0.0625, %v978_v29 }
 0x8df   : > { %v980_v31 = vadd.f32 1e-05, %v979_v30 }
 0x8e1   : > { %1280 = vrsqrt.f32 %v980_v31 }
 0x8eb   : > { %v1281_v36 = vpop.eup %1280 }
 0x8ec   : > { %v982_v38 = vmul.f32 %v1281_v36, %v974_v26 }
 0x8ee   : > { %v987_v40 = vmul.f32 %v986_v34, %v982_v38 }
 0x8f0   : > { %v992_v41 = vadd.f32 %v991_v39, %v987_v40 }
 0x8f2   : > { %993 = vst.msk [vmem:[%s311_s23] sm:$0xff] %vm320_vm1, %v992_v41 }
 0x8f3   : > { %1323 = shalt.err (!%p1320_p7)
}
 0x8f4   : > { %s1324_s22 = scalar_lea.hbm %s1639_s10, 128  ;;  %s1328_s20 = scalar_lea.hbm %s1690_s8, 256 }
 0x8f5   : > { %p1325_p8 = scmp.ne.s32.totalorder %s1639_s10, %s1324_s22  ;;  %p1329_p1 = scmp.lt.u32.totalorder %s1639_s10, %s1690_s8 }
 0x8f6   : > { %p1330_p0 = scmp.lt.u32.totalorder %s1328_s20, %s1324_s22  ;;  %p1332_p6 = scmp.lt.u32.totalorder %s1324_s22, %s1639_s10 }
 0x8f7   : > { %p1326_p11 = pnand %p1325_p8, %p1701_p9 }
 0x8f8   : > { %p1331_p5 = por %p1330_p0, %p1329_p1 }
 0x8f9   : > { %p1327_p13 = pneg %p1326_p11 }
 0x8fa   : > { %p1333_p10 = por %p1332_p6, %p1331_p5 }
 0x8fc   : > { %p1334_p12 = pnand %p1333_p10, %p1327_p13 }
 0x8fe   : > { %1337 = shalt.err (!%p1334_p12)
}
 0x8ff   : > { %1223 = dma.vmem_to_hbm [thread:$0]  (%p1701_p9), %s1641_s24, 128, %s1639_s10, %s995_s12  }
 0x900 PF: > { %p1235_p2 = scmp.ge.s32.totalorder %s1376_s30, 2  ;;  %s1020_s26 = sand.u32 1, %s1364_s27  }
 0x901   : > { %p1702_p3 = scmp.ne.s32.totalorder %s1695_s16, 0  ;;  %s1021_s13 = scalar_lea.sflag [#allocation4], %s1020_s26 }
 0x903   : > { %p1230_p4 = pnand %p1235_p2, %p1702_p3 }
 0x905   : > { %1359 = dma.done.wait (!%p1230_p4), %s1021_s13, 128  }
 0x906   : > { %1361 = vsyncadd (!%p1230_p4), %s1021_s13, 4294967168  ;;  %p19_p7 = scmp.ge.s32.totalorder %s1455_s11, 4   ;;  %s1703_s27 = smov %s1368_s28 }
 0x907   : > { %s1704_s28 = smov %s1372_s29  ;;  %s1705_s29 = smov %s1466_s14 }
 0x908   : > { %s1706_s30 = smov %s1455_s11  ;;  %21 = sbr.rel (!%p19_p7) target bundleno = 4 (0x4), region = 92 }
 0x90f   :  { %1026 = vsyncpa [#allocation3], 1 }
 0x910   :  { %1028 = vsyncpa [#allocation3 + $0x1], 1 }
 0x911   :  { %1029 = vsyncpa [#allocation4], 1 }
 0x912   :  { %1031 = vsyncpa [#allocation4 + $0x1], 1 }

</bundles_post_ra>
